<compile_context>
chip_gen: v6e
topology: v6e:2x2x1
jax: 0.10.0
libtpu: 0.0.40
codegen_flags: <defaults>
</compile_context>

<pallas_src>
import functools

import jax
import jax.numpy as jnp
from jax.experimental import pallas as pl
from jax.experimental.pallas import tpu as pltpu


# ---------------------------------------------------------------------------
# Mask construction (exactly mirrors mflow/made.py's get_mask)
# ---------------------------------------------------------------------------
def get_mask(in_features, out_features, in_flow_features, mask_type=None):
    if mask_type == "input":
        in_degrees = jnp.arange(in_features) % in_flow_features
    else:
        in_degrees = jnp.arange(in_features) % (in_flow_features - 1)

    if mask_type == "output":
        out_degrees = jnp.arange(out_features) % in_flow_features - 1
    else:
        out_degrees = jnp.arange(out_features) % (in_flow_features - 1)

    return (out_degrees[:, None] >= in_degrees[None, :]).astype(jnp.float32)


# ---------------------------------------------------------------------------
# Deterministic parameter init (nn.Linear default: U(-1/sqrt(in), 1/sqrt(in)))
# ---------------------------------------------------------------------------
def _linear_init(key, out_f, in_f, bias=True):
    bound = 1.0 / (in_f ** 0.5)
    kw, kb = jax.random.split(key)
    w = jax.random.uniform(kw, (out_f, in_f), jnp.float32, -bound, bound)
    b = (jax.random.uniform(kb, (out_f,), jnp.float32, -bound, bound)
         if bias else None)
    return w, b


def init_made_params(key, num_inputs, num_hidden, num_cond_inputs=None):
    """Weights kept in PyTorch (out, in) layout, pre-masked.

    Layer-3 weight/bias are split into the m-half and a-half so the kernel
    never slices a (B, 2D) intermediate at a non-128 lane offset.  In the
    conditional case the (unmasked, bias-free) cond weight is fused into the
    first layer: h1 = [W1*mask | Wc] @ [x; cond] + b1.
    """
    D, H = num_inputs, num_hidden
    input_mask = get_mask(D, H, D, mask_type="input")            # (H, D)
    hidden_mask = get_mask(H, H, D)                              # (H, H)
    output_mask = get_mask(H, 2 * D, D, mask_type="output")      # (2D, H)

    k1, k2, k3, kc = jax.random.split(key, 4)
    w1, b1 = _linear_init(k1, H, D)          # joiner.linear
    w2, b2 = _linear_init(k2, H, H)          # trunk[1].linear
    w3, b3 = _linear_init(k3, 2 * D, H)      # trunk[3].linear

    w1m = w1 * input_mask                    # (H, D)
    if num_cond_inputs is not None:
        wc, _ = _linear_init(kc, H, num_cond_inputs, bias=False)  # cond_linear
        w1m = jnp.concatenate([w1m, wc], axis=1)                  # (H, D + C)

    w3_masked = w3 * output_mask             # (2D, H)
    return {
        "w1": w1m,                           # (H, Din)
        "b1": b1.reshape(H, 1),
        "w2": w2 * hidden_mask,              # (H, H)
        "b2": b2.reshape(H, 1),
        "w3m": w3_masked[:D],                # (D, H)   -> m
        "b3m": b3[:D].reshape(D, 1),
        "w3a": w3_masked[D:],                # (D, H)   -> a
        "b3a": b3[D:].reshape(D, 1),
    }


# ---------------------------------------------------------------------------
# Pallas kernel (transposed layout: batch on the lane axis)
# ---------------------------------------------------------------------------
_ACTS = {
    "relu": lambda x: jnp.maximum(x, 0.0),
    "sigmoid": jax.nn.sigmoid,
    "tanh": jnp.tanh,
}


def _made_kernel(xT_ref, w1_ref, b1_ref, w2_ref, b2_ref,
                 w3m_ref, b3m_ref, w3a_ref, b3a_ref,
                 uT_ref, logdet_ref, *, num_inputs, act):
    act_fn = _ACTS[act]
    xT = xT_ref[...]                                            # (Din, TB)
    h = act_fn(jnp.dot(w1_ref[...], xT,
                       preferred_element_type=jnp.float32) + b1_ref[...])
    h = act_fn(jnp.dot(w2_ref[...], h,
                       preferred_element_type=jnp.float32) + b2_ref[...])
    m = jnp.dot(w3m_ref[...], h,
                preferred_element_type=jnp.float32) + b3m_ref[...]   # (D, TB)
    a = jnp.dot(w3a_ref[...], h,
                preferred_element_type=jnp.float32) + b3a_ref[...]   # (D, TB)
    # The first `num_inputs` rows of xT are the (transposed) raw inputs even
    # in the fused conditional case ([x; cond] stacking).
    uT_ref[...] = (xT[:num_inputs, :] - m) * jnp.exp(-a)
    logdet_ref[...] = -jnp.sum(a, axis=0, keepdims=True)            # (1, TB)


# ---------------------------------------------------------------------------
# Wrapper
# ---------------------------------------------------------------------------
def made_forward(params, inputs, cond_inputs=None, act="relu", block_b=512):
    B, D = inputs.shape
    if cond_inputs is None:
        x_in = inputs
    else:
        x_in = jnp.concatenate([inputs, cond_inputs], axis=1)    # (B, D + C)
    Din = x_in.shape[1]
    H = params["w1"].shape[0]

    # Batch tile on the lane axis.  Single full-extent block for small B,
    # otherwise a 128-multiple tile with zero-padding (sliced off below).
    if B <= block_b:
        TB, Bpad = B, B
    else:
        TB = block_b                               # multiple of 128
        Bpad = pl.cdiv(B, TB) * TB

    xT = x_in.T                                    # (Din, B)
    if Bpad != B:
        xT = jnp.pad(xT, ((0, 0), (0, Bpad - B)))

    grid = (Bpad // TB,)
    stream = lambda shape: pl.BlockSpec(shape, lambda i: (0, i))    # per-step
    resident = lambda shape: pl.BlockSpec(shape, lambda i: (0, 0))  # DMA once

    flops = 2 * Bpad * (Din * H + H * H + 2 * D * H)
    bytes_accessed = 4 * (Bpad * (Din + D + 1)
                          + Din * H + H * H + 2 * D * H + 2 * H + 2 * D)
    cost = pl.CostEstimate(flops=flops, transcendentals=Bpad * D,
                           bytes_accessed=bytes_accessed)

    kernel = functools.partial(_made_kernel, num_inputs=D, act=act)
    uT, logdetT = pl.pallas_call(
        kernel,
        out_shape=(jax.ShapeDtypeStruct((D, Bpad), jnp.float32),
                   jax.ShapeDtypeStruct((1, Bpad), jnp.float32)),
        grid=grid,
        in_specs=[
            stream((Din, TB)),        # x^T (streamed)
            resident((H, Din)),       # w1 (fused with wc if conditional)
            resident((H, 1)),         # b1
            resident((H, H)),         # w2
            resident((H, 1)),         # b2
            resident((D, H)),         # w3m
            resident((D, 1)),         # b3m
            resident((D, H)),         # w3a
            resident((D, 1)),         # b3a
        ],
        out_specs=(stream((D, TB)),   # u^T
                   stream((1, TB))),  # logdet row
        compiler_params=pltpu.CompilerParams(
            dimension_semantics=("parallel",)),
        cost_estimate=cost,
    )(xT, params["w1"], params["b1"], params["w2"], params["b2"],
      params["w3m"], params["b3m"], params["w3a"], params["b3a"])

    u = uT.T[:B]                                   # (B, D)
    logdet = logdetT.T[:B]                         # (B, 1)
    return u, logdet


# ---------------------------------------------------------------------------
# Pure-JAX reference (mirrors the PyTorch forward exactly)
# ---------------------------------------------------------------------------
def made_forward_ref(params, inputs, cond_inputs=None, act="relu"):
    act_fn = _ACTS[act]
    x_in = inputs if cond_inputs is None else jnp.concatenate(
        [inputs, cond_inputs], axis=1)
    h = act_fn(x_in @ params["w1"].T + params["b1"].T)
    h = act_fn(h @ params["w2"].T + params["b2"].T)
    m = h @ params["w3m"].T + params["b3m"].T
    a = h @ params["w3a"].T + params["b3a"].T
    u = (inputs - m) * jnp.exp(-a)
    return u, -jnp.sum(a, axis=-1, keepdims=True)


# TODO(synk): MADE.inverse (sequential per-column autoregressive loop) is not
# implemented here; only the forward pass is kernelized.

if __name__ == "__main__":
    num_inputs, num_hidden, num_cond = 8, 32, 4

    key = jax.random.PRNGKey(0)
    kp, kx, kc = jax.random.split(key, 3)

    # --- unconditional MADE, small batch (single full-extent block) --------
    batch = 8
    x = jax.random.normal(kx, (batch, num_inputs), jnp.float32)
    params = init_made_params(kp, num_inputs, num_hidden, num_cond_inputs=None)
    u, logdet = made_forward(params, x)
    jax.block_until_ready((u, logdet))
    u_ref, logdet_ref = made_forward_ref(params, x)
    assert u.shape == (batch, num_inputs) and logdet.shape == (batch, 1)
    assert jnp.allclose(u, u_ref, atol=1e-5, rtol=1e-5)
    assert jnp.allclose(logdet, logdet_ref, atol=1e-5, rtol=1e-5)

    # --- conditional MADE, gridded + padded batch path ----------------------
    batch_c = 300                     # not a multiple of 128: exercises padding
    xc = jax.random.normal(kx, (batch_c, num_inputs), jnp.float32)
    cond = jax.random.normal(kc, (batch_c, num_cond), jnp.float32)
    params_c = init_made_params(kp, num_inputs, num_hidden,
                                num_cond_inputs=num_cond)
    uc, logdetc = made_forward(params_c, xc, cond, block_b=128)
    jax.block_until_ready((uc, logdetc))
    uc_ref, logdetc_ref = made_forward_ref(params_c, xc, cond)
    assert uc.shape == (batch_c, num_inputs) and logdetc.shape == (batch_c, 1)
    assert jnp.allclose(uc, uc_ref, atol=1e-5, rtol=1e-5)
    assert jnp.allclose(logdetc, logdetc_ref, atol=1e-5, rtol=1e-5)

    print("KERNEL_OK")
</pallas_src>

<mosaic_0001>
module attributes {stable_mosaic.version = 11 : i64} {
  func.func @_made_kernel(%arg0: i32, %arg1: memref<8x8xf32, #tpu.memory_space<vmem>>, %arg2: memref<32x8xf32, #tpu.memory_space<vmem>>, %arg3: memref<32x1xf32, #tpu.memory_space<vmem>>, %arg4: memref<32x32xf32, #tpu.memory_space<vmem>>, %arg5: memref<32x1xf32, #tpu.memory_space<vmem>>, %arg6: memref<8x32xf32, #tpu.memory_space<vmem>>, %arg7: memref<8x1xf32, #tpu.memory_space<vmem>>, %arg8: memref<8x32xf32, #tpu.memory_space<vmem>>, %arg9: memref<8x1xf32, #tpu.memory_space<vmem>>, %arg10: memref<8x8xf32, #tpu.memory_space<vmem>>, %arg11: memref<1x8xf32, #tpu.memory_space<vmem>>) attributes {dimension_semantics = [#tpu.dimension_semantics<parallel>], iteration_bounds = array<i64: 1>, scalar_prefetch = 0 : i64, scratch_operands = 0 : i64, tpu.core_type = #tpu.core_type<tc>, window_params = [{transform_indices = @transform_0, window_bounds = array<i64: 8, 8>}, {pipeline_mode = #tpu.pipeline_mode<synchronous>, transform_indices = @transform_1, window_bounds = array<i64: 32, 8>}, {pipeline_mode = #tpu.pipeline_mode<synchronous>, transform_indices = @transform_2, window_bounds = array<i64: 32, 1>}, {pipeline_mode = #tpu.pipeline_mode<synchronous>, transform_indices = @transform_3, window_bounds = array<i64: 32, 32>}, {pipeline_mode = #tpu.pipeline_mode<synchronous>, transform_indices = @transform_4, window_bounds = array<i64: 32, 1>}, {pipeline_mode = #tpu.pipeline_mode<synchronous>, transform_indices = @transform_5, window_bounds = array<i64: 8, 32>}, {pipeline_mode = #tpu.pipeline_mode<synchronous>, transform_indices = @transform_6, window_bounds = array<i64: 8, 1>}, {pipeline_mode = #tpu.pipeline_mode<synchronous>, transform_indices = @transform_7, window_bounds = array<i64: 8, 32>}, {pipeline_mode = #tpu.pipeline_mode<synchronous>, transform_indices = @transform_8, window_bounds = array<i64: 8, 1>}, {transform_indices = @transform_9, window_bounds = array<i64: 8, 8>}, {transform_indices = @transform_10, window_bounds = array<i64: 1, 8>}]} {
    %c0 = arith.constant 0 : index
    %c0_0 = arith.constant 0 : index
    %0 = vector.load %arg1[%c0, %c0_0] : memref<8x8xf32, #tpu.memory_space<vmem>>, vector<8x8xf32>
    %c0_1 = arith.constant 0 : index
    %c0_2 = arith.constant 0 : index
    %1 = vector.load %arg2[%c0_1, %c0_2] : memref<32x8xf32, #tpu.memory_space<vmem>>, vector<32x8xf32>
    %cst = arith.constant dense<0.000000e+00> : vector<32x8xf32>
    %2 = tpu.matmul %1, %0, %cst {dimension_numbers = #tpu.dot_dimension_numbers<[1], [0], [0], [1], [0, 0, 1, 1], [], []>} : vector<32x8xf32>, vector<8x8xf32>, vector<32x8xf32> -> vector<32x8xf32>
    %c0_3 = arith.constant 0 : index
    %c0_4 = arith.constant 0 : index
    %3 = vector.load %arg3[%c0_3, %c0_4] : memref<32x1xf32, #tpu.memory_space<vmem>>, vector<32x1xf32>
    %4 = vector.broadcast %3 : vector<32x1xf32> to vector<32x8xf32>
    %5 = arith.addf %2, %4 : vector<32x8xf32>
    %cst_5 = arith.constant 0.000000e+00 : f32
    %6 = vector.broadcast %cst_5 : f32 to vector<32x8xf32>
    %7 = arith.maximumf %5, %6 : vector<32x8xf32>
    %c0_6 = arith.constant 0 : index
    %c0_7 = arith.constant 0 : index
    %8 = vector.load %arg4[%c0_6, %c0_7] : memref<32x32xf32, #tpu.memory_space<vmem>>, vector<32x32xf32>
    %cst_8 = arith.constant dense<0.000000e+00> : vector<32x8xf32>
    %9 = tpu.matmul %8, %7, %cst_8 {dimension_numbers = #tpu.dot_dimension_numbers<[1], [0], [0], [1], [0, 0, 1, 1], [], []>} : vector<32x32xf32>, vector<32x8xf32>, vector<32x8xf32> -> vector<32x8xf32>
    %c0_9 = arith.constant 0 : index
    %c0_10 = arith.constant 0 : index
    %10 = vector.load %arg5[%c0_9, %c0_10] : memref<32x1xf32, #tpu.memory_space<vmem>>, vector<32x1xf32>
    %11 = vector.broadcast %10 : vector<32x1xf32> to vector<32x8xf32>
    %12 = arith.addf %9, %11 : vector<32x8xf32>
    %cst_11 = arith.constant 0.000000e+00 : f32
    %13 = vector.broadcast %cst_11 : f32 to vector<32x8xf32>
    %14 = arith.maximumf %12, %13 : vector<32x8xf32>
    %c0_12 = arith.constant 0 : index
    %c0_13 = arith.constant 0 : index
    %15 = vector.load %arg6[%c0_12, %c0_13] : memref<8x32xf32, #tpu.memory_space<vmem>>, vector<8x32xf32>
    %cst_14 = arith.constant dense<0.000000e+00> : vector<8x8xf32>
    %16 = tpu.matmul %15, %14, %cst_14 {dimension_numbers = #tpu.dot_dimension_numbers<[1], [0], [0], [1], [0, 0, 1, 1], [], []>} : vector<8x32xf32>, vector<32x8xf32>, vector<8x8xf32> -> vector<8x8xf32>
    %c0_15 = arith.constant 0 : index
    %c0_16 = arith.constant 0 : index
    %17 = vector.load %arg7[%c0_15, %c0_16] : memref<8x1xf32, #tpu.memory_space<vmem>>, vector<8x1xf32>
    %18 = vector.broadcast %17 : vector<8x1xf32> to vector<8x8xf32>
    %19 = arith.addf %16, %18 : vector<8x8xf32>
    %c0_17 = arith.constant 0 : index
    %c0_18 = arith.constant 0 : index
    %20 = vector.load %arg8[%c0_17, %c0_18] : memref<8x32xf32, #tpu.memory_space<vmem>>, vector<8x32xf32>
    %cst_19 = arith.constant dense<0.000000e+00> : vector<8x8xf32>
    %21 = tpu.matmul %20, %14, %cst_19 {dimension_numbers = #tpu.dot_dimension_numbers<[1], [0], [0], [1], [0, 0, 1, 1], [], []>} : vector<8x32xf32>, vector<32x8xf32>, vector<8x8xf32> -> vector<8x8xf32>
    %c0_20 = arith.constant 0 : index
    %c0_21 = arith.constant 0 : index
    %22 = vector.load %arg9[%c0_20, %c0_21] : memref<8x1xf32, #tpu.memory_space<vmem>>, vector<8x1xf32>
    %23 = vector.broadcast %22 : vector<8x1xf32> to vector<8x8xf32>
    %24 = arith.addf %21, %23 : vector<8x8xf32>
    %25 = arith.subf %0, %19 : vector<8x8xf32>
    %cst_22 = arith.constant 0.000000e+00 : f32
    %26 = vector.broadcast %cst_22 : f32 to vector<8x8xf32>
    %27 = arith.subf %26, %24 : vector<8x8xf32>
    %28 = math.exp %27 : vector<8x8xf32>
    %29 = arith.mulf %25, %28 : vector<8x8xf32>
    %c0_23 = arith.constant 0 : index
    %c0_24 = arith.constant 0 : index
    %30 = vector.load %arg10[%c0_23, %c0_24] : memref<8x8xf32, #tpu.memory_space<vmem>>, vector<8x8xf32>
    tpu.vector_store %arg10[%c0_23, %c0_24], %29 {strides = array<i32>} : memref<8x8xf32, #tpu.memory_space<vmem>>, vector<8x8xf32>,
    %cst_25 = arith.constant dense<0.000000e+00> : vector<8xf32>
    %31 = vector.multi_reduction <add>, %24, %cst_25 [0] : vector<8x8xf32> to vector<8xf32>
    %32 = vector.shape_cast %31 : vector<8xf32> to vector<1x8xf32>
    %cst_26 = arith.constant 0.000000e+00 : f32
    %33 = vector.broadcast %cst_26 : f32 to vector<1x8xf32>
    %34 = arith.subf %33, %32 : vector<1x8xf32>
    %c0_27 = arith.constant 0 : index
    %c0_28 = arith.constant 0 : index
    %35 = vector.load %arg11[%c0_27, %c0_28] : memref<1x8xf32, #tpu.memory_space<vmem>>, vector<1x8xf32>
    tpu.vector_store %arg11[%c0_27, %c0_28], %34 {strides = array<i32>} : memref<1x8xf32, #tpu.memory_space<vmem>>, vector<1x8xf32>,
    return
  }
  func.func @transform_0(%arg0: i32) -> (i32, i32) {
    %c0_i32 = arith.constant 0 : i32
    %c0_i32_0 = arith.constant 0 : i32
    return %c0_i32, %arg0 : i32, i32
  }
  func.func @transform_1(%arg0: i32) -> (i32, i32) {
    %c0_i32 = arith.constant 0 : i32
    %c0_i32_0 = arith.constant 0 : i32
    %c0_i32_1 = arith.constant 0 : i32
    return %c0_i32, %c0_i32_0 : i32, i32
  }
  func.func @transform_2(%arg0: i32) -> (i32, i32) {
    %c0_i32 = arith.constant 0 : i32
    %c0_i32_0 = arith.constant 0 : i32
    %c0_i32_1 = arith.constant 0 : i32
    return %c0_i32, %c0_i32_0 : i32, i32
  }
  func.func @transform_3(%arg0: i32) -> (i32, i32) {
    %c0_i32 = arith.constant 0 : i32
    %c0_i32_0 = arith.constant 0 : i32
    %c0_i32_1 = arith.constant 0 : i32
    return %c0_i32, %c0_i32_0 : i32, i32
  }
  func.func @transform_4(%arg0: i32) -> (i32, i32) {
    %c0_i32 = arith.constant 0 : i32
    %c0_i32_0 = arith.constant 0 : i32
    %c0_i32_1 = arith.constant 0 : i32
    return %c0_i32, %c0_i32_0 : i32, i32
  }
  func.func @transform_5(%arg0: i32) -> (i32, i32) {
    %c0_i32 = arith.constant 0 : i32
    %c0_i32_0 = arith.constant 0 : i32
    %c0_i32_1 = arith.constant 0 : i32
    return %c0_i32, %c0_i32_0 : i32, i32
  }
  func.func @transform_6(%arg0: i32) -> (i32, i32) {
    %c0_i32 = arith.constant 0 : i32
    %c0_i32_0 = arith.constant 0 : i32
    %c0_i32_1 = arith.constant 0 : i32
    return %c0_i32, %c0_i32_0 : i32, i32
  }
  func.func @transform_7(%arg0: i32) -> (i32, i32) {
    %c0_i32 = arith.constant 0 : i32
    %c0_i32_0 = arith.constant 0 : i32
    %c0_i32_1 = arith.constant 0 : i32
    return %c0_i32, %c0_i32_0 : i32, i32
  }
  func.func @transform_8(%arg0: i32) -> (i32, i32) {
    %c0_i32 = arith.constant 0 : i32
    %c0_i32_0 = arith.constant 0 : i32
    %c0_i32_1 = arith.constant 0 : i32
    return %c0_i32, %c0_i32_0 : i32, i32
  }
  func.func @transform_9(%arg0: i32) -> (i32, i32) {
    %c0_i32 = arith.constant 0 : i32
    %c0_i32_0 = arith.constant 0 : i32
    return %c0_i32, %arg0 : i32, i32
  }
  func.func @transform_10(%arg0: i32) -> (i32, i32) {
    %c0_i32 = arith.constant 0 : i32
    %c0_i32_0 = arith.constant 0 : i32
    return %c0_i32, %arg0 : i32, i32
  }
}

</mosaic_0001>

<bundles_post_ra>
// kernel: tpu_custom_call.1
= control target key start
LH: loop header
LB: loop body
LE: loop exit
PB: predicated region body
PF: predicated region fallthrough
CT: control target
= control target key end

     0   :  { %16 = vsyncpa [#allocation3], 0  ;;  %vm65_vm0 = vcmask 64512   ;;  %v631_v5 = vmov 0   ;;  %s777_s0 = inlined_call_operand.vmem [shape: f32[8,8], index: 0, kind: input, shape index: {}]   ;;  %s778_s1 = inlined_call_operand.vmem [shape: f32[32,8], index: 1, kind: input, shape index: {}]   ;;  %s779_s2 = inlined_call_operand.vmem [shape: f32[32,1], index: 2, kind: input, shape index: {}]   ;;  %s780_s3 = inlined_call_operand.vmem [shape: f32[32,32], index: 3, kind: input, shape index: {}]   ;;  %s781_s4 = inlined_call_operand.vmem [shape: f32[32,1], index: 4, kind: input, shape index: {}]   ;;  %s782_s5 = inlined_call_operand.vmem [shape: f32[8,32], index: 5, kind: input, shape index: {}]   ;;  %s783_s6 = inlined_call_operand.vmem [shape: f32[8,1], index: 6, kind: input, shape index: {}]   ;;  %s784_s7 = inlined_call_operand.vmem [shape: f32[8,32], index: 7, kind: input, shape index: {}]   ;;  %s785_s8 = inlined_call_operand.vmem [shape: f32[8,1], index: 8, kind: input, shape index: {}]   ;;  %s786_s9 = inlined_call_operand.hbm [shape: f32[8,8], index: 9, kind: output, shape index: {0}]   ;;  %s787_s10 = inlined_call_operand.hbm [shape: f32[1,8], index: 10, kind: output, shape index: {1}]  }
   0x1   :  { %v694_v0 = vld [vmem:[%s777_s0] sm:$0xff]  ;;  %v38_v2 = vld [vmem:[%s778_s1 + $0x8] sm:$0xff]  ;;  %v39_v3 = vld [vmem:[%s778_s1 + $0x10] sm:$0xff]  ;;  %583 = vset.pattern.permute.xlu0 %v631_v5  ;;  %584 = vset.pattern.permute.xlu1 %v631_v5 }
   0x2   :  { %v37_v1 = vld [vmem:[%s778_s1] sm:$0xff]  ;;  %534 = vmatprep.subr.mxu0 %v694_v0  ;;  %v44_v4 = vld [vmem:[%s779_s2 + $0x18] sm:$0xff]  ;;  %v42_v6 = vld [vmem:[%s779_s2 + $0x8] sm:$0xff] }
   0x3   :  { %536 = vmatprep.mubr.msk.f32.mxu0 %vm65_vm0, %v37_v1  ;;  %535 = vmatpush3.msra.mxu0 %v694_v0  ;;  %v40_v7 = vld [vmem:[%s778_s1 + $0x18] sm:$0xff]  ;;  %v43_v8 = vld [vmem:[%s779_s2 + $0x10] sm:$0xff] }
   0x4   :  { %537 = vmatmul.mubr.msk.f32.vlgmr.msra.gmra.mxu0 %vm65_vm0, %v38_v2  ;;  %62 = vperm.xlu0 %583, %v44_v4  }
   0x5   :  { %539 = vmatprep.mubr.msk.f32.mxu0 %vm65_vm0, %v39_v3  ;;  %52 = vperm.xlu1 %584, %v42_v6  }
   0x6   :  { %17 = vsyncpa [#allocation5], 0  ;;  %v41_v9 = vld [vmem:[%s779_s2] sm:$0xff]  ;;  %v174_v10 = vld [vmem:[%s781_s4 + $0x18] sm:$0xff]  ;;  %vm195_vm1 = vcmask 261120   ;;  %v632_v36 = vmov 0.0  }
   0x7   :  { %v173_v11 = vld [vmem:[%s781_s4 + $0x10] sm:$0xff]  ;;  %v172_v12 = vld [vmem:[%s781_s4 + $0x8] sm:$0xff]  ;;  %v171_v13 = vld [vmem:[%s781_s4] sm:$0xff]  ;;  %556 = vmatprep.subr.mxu0 %v632_v36  ;;  %vm633_vm2 = vmmov 0   ;;  %vm471_vm3 = vcmask 57344   ;;  %s635_s27 = smov [#allocation2]  }
   0x8   :  { %540 = vmatmul.mubr.msk.f32.gmra.mxu0 %vm65_vm0, %v40_v7  ;;  %57 = vperm.xlu0 %583, %v43_v8   ;;  %v378_v14 = vld [vmem:[%s785_s8] sm:$0xff]  ;;  %v168_v33 = vld [vmem:[%s780_s3 + $0x8] sm:$0xff]  ;;  %v169_v34 = vld [vmem:[%s780_s3 + $0x10] sm:$0xff]  ;;  %s479_s28 = sshll.u32 %s635_s27, 4  ;;  %s480_s28 = int_to_ptr.vmem [resolvable:$true] %s479_s28 }
   0x9   :  { %47 = vperm.xlu1 %584, %v41_v9   ;;  %v298_v15 = vld [vmem:[%s783_s6] sm:$0xff]  ;;  %v170_v35 = vld [vmem:[%s780_s3 + $0x18] sm:$0xff]  ;;  %564 = vmatprep.mubr.msk.f32.mxu0 %vm633_vm2, %v632_v36 }
   0xa   :  { %v167_v16 = vld [vmem:[%s780_s3] sm:$0xff] }
   0xb   :  { %550 = vmatprep.mubr.msk.f32.mxu1 %vm195_vm1, %v167_v16  ;;  %v297_v53 = vld [vmem:[%s782_s5] sm:$0xff]  ;;  %s634_s5 = smov [#allocation4]  }
   0xc   :  { %192 = vperm.xlu0 %583, %v174_v10   ;;  %v377_v54 = vld [vmem:[%s784_s7] sm:$0xff]  ;;  %s489_s7 = sshll.u32 %s634_s5, 4  ;;  %s490_s7 = int_to_ptr.vmem [resolvable:$true] %s489_s7 }
   0xd   :  { %187 = vperm.xlu1 %584, %v173_v11   ;;  %s587_s29 = scalar_lea.vmem %s490_s7, 16  ;;  %s591_s30 = scalar_lea.vmem %s490_s7, 32 }
   0xe   :  { %p588_p0 = scmp.ne.s32.totalorder %s490_s7, %s587_s29  ;;  %p592_p1 = scmp.lt.s32.totalorder %s490_s7, %s490_s7 }
   0xf   :  { %p593_p2 = scmp.lt.s32.totalorder %s591_s30, %s587_s29 }
  0x10   :  { %182 = vperm.xlu0 %583, %v172_v12  }
  0x11   :  { %177 = vperm.xlu1 %584, %v171_v13   ;;  %p594_p3 = por %p593_p2, %p592_p1 }
  0x13   :  { %p595_p4 = pnand %p594_p3, %p588_p0 }
  0x14   :  { %381 = vperm.xlu0 %583, %v378_v14  }
  0x15   :  { %301 = vperm.xlu1 %584, %v298_v15  }
  0x7f   :  { %v63_v17 = vpop.permute.xlu0 %62 }
  0x80   :  { %v53_v19 = vpop.permute.xlu1 %52 }
  0x83   :  { %v58_v23 = vpop.permute.xlu0 %57 }
  0x84   :  { %v48_v28 = vpop.permute.xlu1 %47 }
  0x87   :  { %v193_v37 = vpop.permute.xlu0 %192 }
  0x88   :  { %v188_v39 = vpop.permute.xlu1 %187 }
  0x8b   :  { %v183_v43 = vpop.permute.xlu0 %182 }
  0x8c   :  { %v178_v48 = vpop.permute.xlu1 %177 }
  0x8f   :  { %v382_v55 = vpop.permute.xlu0 %381 }
  0x90   :  { %v302_v6 = vpop.permute.xlu1 %301 }
  0xc4   :  { %v538_v18 = vpop.f32.mrf.mxu0 }
  0xc5   :  { %v150_v25 = vadd.f32 %v538_v18, %v53_v19 }
  0xc6   :  { %v144_v20 = vpop.f32.mrf.mxu0 }
  0xc7   :  { %v145_v29 = vadd.f32 %v144_v20, %v48_v28  ;;  %v164_v31 = vmax.f32 %v150_v25, 0.0 }
  0xc8   :  { %v541_v21 = vpop.f32.mrf.mxu0 }
  0xc9   :  { %v160_v22 = vadd.f32 %v541_v21, %v63_v17  ;;  %v163_v32 = vmax.f32 %v145_v29, 0.0 }
  0xca   :  { %v154_v24 = vpop.f32.mrf.mxu0 }
  0xcb   :  { %v166_v26 = vmax.f32 %v160_v22, 0.0  ;;  %v155_v27 = vadd.f32 %v154_v24, %v58_v23 }
  0xcd   :  { %v165_v30 = vmax.f32 %v155_v27, 0.0  ;;  %542 = vmatprep.subr.mxu1 %v166_v26 }
  0xce   :  { %543 = vmatpush3.msra.mxu1 %v166_v26 }
  0xcf   :  { %544 = vmatprep.subr.mxu1 %v165_v30 }
  0xd0   :  { %545 = vmatpush3.msra.mxu1 %v165_v30 }
  0xd1   :  { %546 = vmatprep.subr.mxu1 %v164_v31 }
  0xd2   :  { %547 = vmatpush3.msra.mxu1 %v164_v31 }
  0xd3   :  { %548 = vmatprep.subr.mxu1 %v163_v32 }
  0xd4   :  { %549 = vmatpush3.msra.mxu1 %v163_v32 }
  0xd5   :  { %551 = vmatmul.mubr.msk.f32.vlgmr.msra.gmra.mxu1 %vm195_vm1, %v168_v33  ;;  %567 = vmatprep.subr.mxu1 %v632_v36 }
  0xd6   :  { %553 = vmatprep.mubr.msk.f32.mxu1 %vm195_vm1, %v169_v34 }
  0xd9   :  { %554 = vmatmul.mubr.msk.f32.gmra.mxu1 %vm195_vm1, %v170_v35 }
  0xda   :  { %575 = vmatprep.mubr.msk.f32.mxu1 %vm633_vm2, %v632_v36 }
 0x195   :  { %v552_v38 = vpop.f32.mrf.mxu1 }
 0x196   :  { %v280_v45 = vadd.f32 %v552_v38, %v183_v43 }
 0x197   :  { %v274_v40 = vpop.f32.mrf.mxu1 }
 0x198   :  { %v275_v49 = vadd.f32 %v274_v40, %v178_v48  ;;  %v294_v51 = vmax.f32 %v280_v45, 0.0 }
 0x199   :  { %v555_v41 = vpop.f32.mrf.mxu1 }
 0x19a   :  { %v290_v42 = vadd.f32 %v555_v41, %v193_v37  ;;  %v293_v52 = vmax.f32 %v275_v49, 0.0 }
 0x19b   :  { %v284_v44 = vpop.f32.mrf.mxu1 }
 0x19c   :  { %v296_v46 = vmax.f32 %v290_v42, 0.0  ;;  %v285_v47 = vadd.f32 %v284_v44, %v188_v39 }
 0x19e   :  { %v295_v50 = vmax.f32 %v285_v47, 0.0  ;;  %557 = vmatpush3.msra.mxu0 %v296_v46  ;;  %568 = vmatpush3.msra.mxu1 %v296_v46 }
 0x19f   :  { %558 = vmatprep.subr.mxu0 %v632_v36  ;;  %569 = vmatprep.subr.mxu1 %v632_v36 }
 0x1a0   :  { %559 = vmatpush3.msra.mxu0 %v295_v50  ;;  %570 = vmatpush3.msra.mxu1 %v295_v50 }
 0x1a1   :  { %560 = vmatprep.subr.mxu0 %v632_v36  ;;  %571 = vmatprep.subr.mxu1 %v632_v36 }
 0x1a2   :  { %561 = vmatpush3.msra.mxu0 %v294_v51  ;;  %572 = vmatpush3.msra.mxu1 %v294_v51 }
 0x1a3   :  { %562 = vmatprep.subr.mxu0 %v632_v36  ;;  %573 = vmatprep.subr.mxu1 %v632_v36 }
 0x1a4   :  { %563 = vmatpush3.msra.mxu0 %v293_v52  ;;  %574 = vmatpush3.msra.mxu1 %v293_v52 }
 0x1a5   :  { %565 = vmatmul.mubr.msk.f32.vlgmr.msra.gmra.mxu0 %vm195_vm1, %v297_v53  ;;  %576 = vmatmul.mubr.msk.f32.vlgmr.msra.gmra.mxu1 %vm195_vm1, %v377_v54 }
 0x265   :  { %v373_v56 = vpop.f32.mrf.mxu0  ;;  %v453_v57 = vpop.f32.mrf.mxu1 }
 0x266   :  { %v454_v58 = vadd.f32 %v453_v57, %v382_v55  ;;  %v374_v8 = vadd.f32 %v373_v56, %v302_v6 }
 0x267   :  { %v577_v59 = vpop.f32.mrf.mxu1  ;;  %v566_v60 = vpop.f32.mrf.mxu0 }
 0x268   :  { %v458_v61 = vsub.f32 0.0, %v454_v58  ;;  %v463_v62 = vsel %vm65_vm0, %v454_v58, 0.0  ;;  %v457_v10 = vsub.f32 %v694_v0, %v374_v8 }
 0x269   :  { %v464_v63 = vrot.slane %v463_v62, 4 }
 0x26a   :  { %v459_v1 = vmul.f32 1.442695, %v458_v61 }
 0x26b   :  { %v465_v2 = vadd.f32 %v464_v63, %v463_v62 }
 0x26c   :  { %585 = vpow2.f32 %v459_v1 }
 0x26d   :  { %v466_v3 = vrot.slane %v465_v2, 2 }
 0x26f   :  { %v467_v4 = vadd.f32 %v466_v3, %v465_v2 }
 0x271   :  { %v468_v5 = vrot.slane %v467_v4, 1 }
 0x273   :  { %v469_v7 = vadd.f32 %v468_v5, %v467_v4 }
 0x275   :  { %v470_v9 = vsub.f32 0.0, %v469_v7 }
 0x277   :  { %472 = vst.msk [vmem:[#allocation4] sm:$0x1] %vm471_vm3, %v470_v9 }
 0x278   :  { %598 = shalt.err (!%p595_p4)
}
 0x279   :  { %492 = dma.vmem_to_hbm [thread:$0]  %s490_s7, 16, %s787_s10, [#allocation5]   ;;  %v586_v11 = vpop.eup %585 }
 0x27a   :  { %v461_v12 = vmul.f32 %v586_v11, %v457_v10  ;;  %s607_s12 = scalar_lea.vmem %s480_s28, 128  ;;  %p612_p6 = scmp.lt.s32.totalorder %s480_s28, %s480_s28 }
 0x27b   :  { %p608_p5 = scmp.ne.s32.totalorder %s480_s28, %s607_s12  ;;  %p613_p7 = scmp.lt.s32.totalorder %s607_s12, %s607_s12 }
 0x27c   :  { %462 = vst.msk [vmem:[#allocation2] sm:$0xff] %vm65_vm0, %v461_v12 }
 0x27d   :  { %p614_p8 = por %p613_p7, %p612_p6 }
 0x27f   :  { %p615_p9 = pnand %p614_p8, %p608_p5 }
 0x281   :  { %618 = shalt.err (!%p615_p9)
}
 0x282   :  { %482 = dma.vmem_to_hbm [thread:$0]  %s480_s28, 128, %s786_s9, [#allocation3]  }
 0x283   :  { %627 = dma.done.wait [#allocation3], 128  }
 0x284   :  { %628 = vsyncadd [#allocation3], 4294967168 }
 0x285   :  { %629 = dma.done.wait [#allocation5], 16  }
 0x286   :  { %630 = vsyncadd [#allocation5], 4294967280 }
 0x287   :  { %499 = vsyncpa [#allocation3], 1 }
 0x288   :  { %500 = vsyncpa [#allocation5], 1 }

</bundles_post_ra>
